<compile_context>
chip_gen: v7x
topology: tpu7x:2x2x1
jax: 0.10.0
libtpu: 0.0.40
codegen_flags: <defaults>
</compile_context>

<pallas_src>
import functools

import jax
import jax.numpy as jnp
from jax import lax
from jax.experimental import pallas as pl
from jax.experimental.pallas import tpu as pltpu


# ---------------------------------------------------------------------------
# helpers
# ---------------------------------------------------------------------------
def _round_up(x, m):
    return (x + m - 1) // m * m


def _tile_padded_bytes(shape, dtype):
    """Bytes of `shape` after Mosaic (sublane, 128)-tile padding."""
    itemsize = jnp.dtype(dtype).itemsize
    sub = 8 * max(1, 4 // itemsize)            # f32 -> 8 sublanes, bf16 -> 16
    dims = [int(d) for d in shape]
    dims[-1] = _round_up(dims[-1], 128)
    if len(dims) >= 2:
        dims[-2] = _round_up(dims[-2], sub)
    n = 1
    for d in dims:
        n *= d
    return n * itemsize


def _vmem_capacity_bytes():
    try:
        cap = int(pltpu.get_tpu_info().vmem_capacity_bytes)
        if cap > 0:
            return cap
    except Exception:
        pass
    return 64 * 1024 * 1024                    # conservative default (v7x per-core)


# ---------------------------------------------------------------------------
# kernel
# ---------------------------------------------------------------------------
def _bn_act_conv_kernel(x_ref, scale_ref, bias_ref, t_ref, out_ref, act_ref, *,
                        H, Cout, KH, SH, PH, Wo, tile_ho, hin):
    r = pl.program_id(1)
    step = tile_ho * SH
    row0 = pl.multiple_of(r * step, step)

    # --- BN + ReLU on this tile's haloed row window (f32 math on the VPU).
    # x is lane-dense (rows, Wp*Cin); W-halo lanes have scale = bias = 0, so they
    # come out exactly 0.  H-halo rows are zeroed with one branch-free select.
    xwin = x_ref[0, pl.ds(row0, hin), :]                     # (hin, Wp*Cin) f32
    act = jnp.maximum(xwin * scale_ref[...] + bias_ref[...], 0.0)
    if PH > 0:
        rows = row0 + lax.broadcasted_iota(jnp.int32, act.shape, 0)
        act = jnp.where((rows >= PH) & (rows < PH + H), act, 0.0)
    act_ref[...] = act.astype(jnp.bfloat16)

    # --- Convolution: KH matmuls, f32 accumulation on the MXU.
    # LHS = contiguous row slab of the activation scratch (no im2col, no reshape),
    # RHS = per-kh lowered weight (Wp*Cin, Wo*Cout) -> lane-dense result.
    acc = None
    for kh in range(KH):
        if SH == 1:
            a_kh = act_ref[pl.ds(kh, tile_ho), :]
        else:
            a_kh = act_ref[pl.ds(kh, tile_ho, SH), :]
        d = jnp.dot(a_kh, t_ref[kh], preferred_element_type=jnp.float32)
        acc = d if acc is None else acc + d

    out_ref[0] = acc                                         # (tile_ho, Wo*Cout) f32


# ---------------------------------------------------------------------------
# wrapper
# ---------------------------------------------------------------------------
def bn_act_conv2d(x_nchw, gamma, beta, running_mean, running_var, weight_oihw,
                  *, stride=1, padding=0, groups=1, eps=1e-3, tile_ho=None):
    """Forward of BnActConv2d. x_nchw: (N, Cin, H, W). Returns (N, Cout, Ho, Wo)."""
    assert groups == 1  # TODO(synk): grouped convolution (DPN 3x3 branches) not implemented
    N, Cin, H, W = (int(d) for d in x_nchw.shape)
    Cout, Cin_w, KH, KW = (int(d) for d in weight_oihw.shape)
    assert Cin_w == Cin
    SH = SW = int(stride)
    PH = PW = int(padding)
    Ho = (H + 2 * PH - KH) // SH + 1
    Wo = (W + 2 * PW - KW) // SW + 1
    Hp = H + 2 * PH
    Wp = W + 2 * PW

    # Row tile: largest divisor of Ho that is a multiple of 8 (sublane aligned) and
    # <= the requested / default cap; the full extent is always a legal block.
    cap_t = int(tile_ho) if tile_ho is not None else min(Ho, 64)
    t_sel = Ho
    for t in range(min(cap_t, Ho), 0, -1):
        if Ho % t == 0 and t % 8 == 0:
            t_sel = t
            break
    tile_ho = t_sel
    R = Ho // tile_ho
    hin = (tile_ho - 1) * SH + KH                 # haloed input rows per tile

    # ---- BN folded (inference running stats) into per-channel scale/bias, then
    # broadcast to lane-dense rows with the W halo masked out (scale = bias = 0).
    scale = (gamma / jnp.sqrt(running_var + eps)).astype(jnp.float32)
    bias = (beta - running_mean * scale).astype(jnp.float32)
    wp_ok = (jnp.arange(Wp) >= PW) & (jnp.arange(Wp) < PW + W)
    scale_row = jnp.where(wp_ok[:, None], scale[None, :], 0.0).reshape(1, Wp * Cin)
    bias_row = jnp.where(wp_ok[:, None], bias[None, :], 0.0).reshape(1, Wp * Cin)

    # ---- lane-dense, zero-padded input: (N, Hp, Wp*Cin) f32.
    # TODO(synk): in an NHWC-native network this transpose+pad disappears.
    x_nhwc = jnp.transpose(x_nchw, (0, 2, 3, 1)).astype(jnp.float32)
    x_pad = jnp.pad(x_nhwc, ((0, 0), (PH, PH), (PW, PW), (0, 0)))
    x_lane = x_pad.reshape(N, Hp, Wp * Cin)

    # ---- per-kh lowered ("Toeplitz") weight, built once on the host/XLA side:
    # T[kh, (wo*SW + kw)*Cin + c, wo*Cout + o] = weight[o, c, kh, kw].
    w_t = jnp.transpose(weight_oihw.astype(jnp.float32), (2, 3, 1, 0))  # (KH,KW,Cin,Cout)
    wo_idx = jnp.arange(Wo)
    t_planes = []
    for kh in range(KH):
        t4 = jnp.zeros((Wp, Cin, Wo, Cout), jnp.float32)
        for kw in range(KW):
            t4 = t4.at[wo_idx * SW + kw, :, wo_idx, :].set(
                jnp.broadcast_to(w_t[kh, kw], (Wo, Cin, Cout)))
        t_planes.append(t4.reshape(Wp * Cin, Wo * Cout))
    toeplitz = jnp.stack(t_planes, axis=0).astype(jnp.bfloat16)  # (KH, Wp*Cin, Wo*Cout)

    kernel = functools.partial(
        _bn_act_conv_kernel, H=H, Cout=Cout, KH=KH, SH=SH, PH=PH,
        Wo=Wo, tile_ho=tile_ho, hin=hin)

    # ---- padding-aware VMEM budget (double-buffered blocks + scratch).
    need = (2 * _tile_padded_bytes((1, Hp, Wp * Cin), jnp.float32)
            + 2 * 2 * _tile_padded_bytes((1, Wp * Cin), jnp.float32)
            + 2 * _tile_padded_bytes((KH, Wp * Cin, Wo * Cout), jnp.bfloat16)
            + 2 * _tile_padded_bytes((1, tile_ho, Wo * Cout), jnp.float32)
            + _tile_padded_bytes((hin, Wp * Cin), jnp.bfloat16))
    need = int(need * 1.25)                        # ~20% headroom
    vmem_cap = _vmem_capacity_bytes()
    if need > int(0.75 * vmem_cap):
        raise ValueError(
            f"BnActConv2d tile does not fit VMEM: need ~{need >> 20} MiB of "
            f"{vmem_cap >> 20} MiB available; reduce tile_ho.")
    vmem_limit = int(min(max(2 * need, 32 * 1024 * 1024), int(0.9 * vmem_cap)))

    out3d = pl.pallas_call(
        kernel,
        out_shape=jax.ShapeDtypeStruct((N, Ho, Wo * Cout), jnp.float32),
        grid_spec=pltpu.PrefetchScalarGridSpec(
            num_scalar_prefetch=0,
            grid=(N, R),
            in_specs=[
                pl.BlockSpec((1, Hp, Wp * Cin), lambda n, r: (n, 0, 0)),
                pl.BlockSpec((1, Wp * Cin), lambda n, r: (0, 0)),
                pl.BlockSpec((1, Wp * Cin), lambda n, r: (0, 0)),
                pl.BlockSpec((KH, Wp * Cin, Wo * Cout), lambda n, r: (0, 0, 0)),
            ],
            out_specs=pl.BlockSpec((1, tile_ho, Wo * Cout),
                                   lambda n, r: (n, r, 0)),
            scratch_shapes=[pltpu.VMEM((hin, Wp * Cin), jnp.bfloat16)]),
        compiler_params=pltpu.CompilerParams(
            dimension_semantics=("parallel", "parallel"),
            vmem_limit_bytes=vmem_limit),
    )(x_lane, scale_row, bias_row, toeplitz)

    out_nhwc = out3d.reshape(N, Ho, Wo, Cout)
    # TODO(synk): an NHWC consumer can take out_nhwc directly (skips this HBM pass).
    return jnp.transpose(out_nhwc, (0, 3, 1, 2))


# ---------------------------------------------------------------------------
# reference
# ---------------------------------------------------------------------------
def _reference(x_nchw, gamma, beta, running_mean, running_var, weight_oihw,
               *, stride, padding, eps):
    scale = gamma / jnp.sqrt(running_var + eps)
    bias = beta - running_mean * scale
    act = jnp.maximum(
        x_nchw * scale[None, :, None, None] + bias[None, :, None, None], 0.0)
    # Match the kernel: bf16 matmul operands, f32 accumulation.
    return lax.conv_general_dilated(
        act.astype(jnp.bfloat16), weight_oihw.astype(jnp.bfloat16),
        (stride, stride), [(padding, padding), (padding, padding)],
        dimension_numbers=("NCHW", "OIHW", "NCHW"),
        preferred_element_type=jnp.float32)


if __name__ == "__main__":
    # BnActConv2d(in_chs=16, out_chs=32, kernel_size=3, stride=1, padding=1)
    N, Cin, H, W = 2, 16, 16, 16
    Cout, K, stride, padding = 32, 3, 1, 1
    eps = 1e-3

    key = jax.random.PRNGKey(0)
    kx, kw, kg, kb, km, kv = jax.random.split(key, 6)

    x = jax.random.normal(kx, (N, Cin, H, W), dtype=jnp.float32)
    weight = jax.random.normal(kw, (Cout, Cin, K, K), dtype=jnp.float32) * 0.1
    gamma = 1.0 + 0.1 * jax.random.normal(kg, (Cin,), dtype=jnp.float32)
    beta = 0.1 * jax.random.normal(kb, (Cin,), dtype=jnp.float32)
    running_mean = 0.1 * jax.random.normal(km, (Cin,), dtype=jnp.float32)
    running_var = jax.random.uniform(kv, (Cin,), jnp.float32, 0.5, 1.5)

    # tile_ho=8 -> grid (N=2, R=2): exercises both (fully parallel) grid axes.
    out = bn_act_conv2d(x, gamma, beta, running_mean, running_var, weight,
                        stride=stride, padding=padding, groups=1, eps=eps,
                        tile_ho=8)
    out = jax.block_until_ready(out)

    ref = _reference(x, gamma, beta, running_mean, running_var, weight,
                     stride=stride, padding=padding, eps=eps)
    ref = jax.block_until_ready(ref)

    assert out.shape == (N, Cout, H, W)
    max_err = jnp.max(jnp.abs(out - ref))
    assert jnp.allclose(out, ref, atol=2e-3, rtol=2e-3), \
        f"max abs err = {max_err}"
    print("KERNEL_OK")
</pallas_src>

<mosaic_0001>
module attributes {stable_mosaic.version = 11 : i64} {
  func.func @_bn_act_conv_kernel(%arg0: i32, %arg1: i32, %arg2: memref<1x18x288xf32, #tpu.memory_space<vmem>>, %arg3: memref<1x288xf32, #tpu.memory_space<vmem>>, %arg4: memref<1x288xf32, #tpu.memory_space<vmem>>, %arg5: memref<3x288x512xbf16, #tpu.memory_space<vmem>>, %arg6: memref<1x8x512xf32, #tpu.memory_space<vmem>>, %arg7: memref<10x288xbf16, #tpu.memory_space<vmem>>) attributes {dimension_semantics = [#tpu.dimension_semantics<parallel>, #tpu.dimension_semantics<parallel>], iteration_bounds = array<i64: 2, 2>, scalar_prefetch = 0 : i64, scratch_operands = 1 : i64, tpu.core_type = #tpu.core_type<tc>, window_params = [{transform_indices = @transform_0, window_bounds = array<i64: 1, 18, 288>}, {pipeline_mode = #tpu.pipeline_mode<synchronous>, transform_indices = @transform_1, window_bounds = array<i64: 1, 288>}, {pipeline_mode = #tpu.pipeline_mode<synchronous>, transform_indices = @transform_2, window_bounds = array<i64: 1, 288>}, {pipeline_mode = #tpu.pipeline_mode<synchronous>, transform_indices = @transform_3, window_bounds = array<i64: 3, 288, 512>}, {transform_indices = @transform_4, window_bounds = array<i64: 1, 8, 512>}]} {
    %c8_i32 = arith.constant 8 : i32
    %0 = arith.muli %arg1, %c8_i32 : i32
    %1 = tpu.assume_multiple %0, 8 : i32
    %c0 = arith.constant 0 : index
    %2 = arith.index_cast %1 : i32 to index
    %c0_0 = arith.constant 0 : index
    %3 = vector.load %arg2[%c0, %2, %c0_0] : memref<1x18x288xf32, #tpu.memory_space<vmem>>, vector<1x10x288xf32>
    %4 = vector.shape_cast %3 : vector<1x10x288xf32> to vector<10x288xf32>
    %c0_1 = arith.constant 0 : index
    %c0_2 = arith.constant 0 : index
    %5 = vector.load %arg3[%c0_1, %c0_2] : memref<1x288xf32, #tpu.memory_space<vmem>>, vector<1x288xf32>
    %6 = vector.broadcast %5 : vector<1x288xf32> to vector<10x288xf32>
    %7 = arith.mulf %4, %6 : vector<10x288xf32>
    %c0_3 = arith.constant 0 : index
    %c0_4 = arith.constant 0 : index
    %8 = vector.load %arg4[%c0_3, %c0_4] : memref<1x288xf32, #tpu.memory_space<vmem>>, vector<1x288xf32>
    %9 = vector.broadcast %8 : vector<1x288xf32> to vector<10x288xf32>
    %10 = arith.addf %7, %9 : vector<10x288xf32>
    %cst = arith.constant 0.000000e+00 : f32
    %11 = vector.broadcast %cst : f32 to vector<10x288xf32>
    %12 = arith.maximumf %10, %11 : vector<10x288xf32>
    %13 = tpu.iota {dimensions = array<i32: 0>} : vector<10x288xi32>
    %14 = vector.broadcast %1 : i32 to vector<10x288xi32>
    %15 = arith.addi %14, %13 : vector<10x288xi32>
    %c1_i32 = arith.constant 1 : i32
    %16 = vector.broadcast %c1_i32 : i32 to vector<10x288xi32>
    %17 = arith.cmpi sge, %15, %16 : vector<10x288xi32>
    %c17_i32 = arith.constant 17 : i32
    %18 = vector.broadcast %c17_i32 : i32 to vector<10x288xi32>
    %19 = arith.cmpi slt, %15, %18 : vector<10x288xi32>
    %20 = arith.andi %17, %19 : vector<10x288xi1>
    %cst_5 = arith.constant 0.000000e+00 : f32
    %21 = vector.broadcast %cst_5 : f32 to vector<10x288xf32>
    %22 = arith.select %20, %12, %21 : vector<10x288xi1>, vector<10x288xf32>
    %23 = arith.truncf %22 : vector<10x288xf32> to vector<10x288xbf16>
    %c0_6 = arith.constant 0 : index
    %c0_7 = arith.constant 0 : index
    %24 = vector.load %arg7[%c0_6, %c0_7] : memref<10x288xbf16, #tpu.memory_space<vmem>>, vector<10x288xbf16>
    tpu.vector_store %arg7[%c0_6, %c0_7], %23 {strides = array<i32>} : memref<10x288xbf16, #tpu.memory_space<vmem>>, vector<10x288xbf16>,
    %c0_8 = arith.constant 0 : index
    %c0_9 = arith.constant 0 : index
    %25 = vector.load %arg7[%c0_8, %c0_9] : memref<10x288xbf16, #tpu.memory_space<vmem>>, vector<8x288xbf16>
    %c0_10 = arith.constant 0 : index
    %c0_11 = arith.constant 0 : index
    %c0_12 = arith.constant 0 : index
    %26 = vector.load %arg5[%c0_10, %c0_11, %c0_12] : memref<3x288x512xbf16, #tpu.memory_space<vmem>>, vector<1x288x512xbf16>
    %27 = vector.shape_cast %26 : vector<1x288x512xbf16> to vector<288x512xbf16>
    %cst_13 = arith.constant dense<0.000000e+00> : vector<8x512xf32>
    %28 = tpu.matmul %25, %27, %cst_13 {dimension_numbers = #tpu.dot_dimension_numbers<[1], [0], [0], [1], [0, 0, 1, 1], [], []>} : vector<8x288xbf16>, vector<288x512xbf16>, vector<8x512xf32> -> vector<8x512xf32>
    %c1 = arith.constant 1 : index
    %c0_14 = arith.constant 0 : index
    %29 = vector.load %arg7[%c1, %c0_14] : memref<10x288xbf16, #tpu.memory_space<vmem>>, vector<8x288xbf16>
    %c1_15 = arith.constant 1 : index
    %c0_16 = arith.constant 0 : index
    %c0_17 = arith.constant 0 : index
    %30 = vector.load %arg5[%c1_15, %c0_16, %c0_17] : memref<3x288x512xbf16, #tpu.memory_space<vmem>>, vector<1x288x512xbf16>
    %31 = vector.shape_cast %30 : vector<1x288x512xbf16> to vector<288x512xbf16>
    %cst_18 = arith.constant dense<0.000000e+00> : vector<8x512xf32>
    %32 = tpu.matmul %29, %31, %cst_18 {dimension_numbers = #tpu.dot_dimension_numbers<[1], [0], [0], [1], [0, 0, 1, 1], [], []>} : vector<8x288xbf16>, vector<288x512xbf16>, vector<8x512xf32> -> vector<8x512xf32>
    %33 = arith.addf %28, %32 : vector<8x512xf32>
    %c2 = arith.constant 2 : index
    %c0_19 = arith.constant 0 : index
    %34 = vector.load %arg7[%c2, %c0_19] : memref<10x288xbf16, #tpu.memory_space<vmem>>, vector<8x288xbf16>
    %c2_20 = arith.constant 2 : index
    %c0_21 = arith.constant 0 : index
    %c0_22 = arith.constant 0 : index
    %35 = vector.load %arg5[%c2_20, %c0_21, %c0_22] : memref<3x288x512xbf16, #tpu.memory_space<vmem>>, vector<1x288x512xbf16>
    %36 = vector.shape_cast %35 : vector<1x288x512xbf16> to vector<288x512xbf16>
    %cst_23 = arith.constant dense<0.000000e+00> : vector<8x512xf32>
    %37 = tpu.matmul %34, %36, %cst_23 {dimension_numbers = #tpu.dot_dimension_numbers<[1], [0], [0], [1], [0, 0, 1, 1], [], []>} : vector<8x288xbf16>, vector<288x512xbf16>, vector<8x512xf32> -> vector<8x512xf32>
    %38 = arith.addf %33, %37 : vector<8x512xf32>
    %c0_24 = arith.constant 0 : index
    %c0_25 = arith.constant 0 : index
    %c0_26 = arith.constant 0 : index
    %39 = vector.load %arg6[%c0_24, %c0_25, %c0_26] : memref<1x8x512xf32, #tpu.memory_space<vmem>>, vector<1x8x512xf32>
    %40 = vector.shape_cast %39 : vector<1x8x512xf32> to vector<8x512xf32>
    %41 = vector.shape_cast %38 : vector<8x512xf32> to vector<1x8x512xf32>
    tpu.vector_store %arg6[%c0_24, %c0_25, %c0_26], %41 {strides = array<i32>} : memref<1x8x512xf32, #tpu.memory_space<vmem>>, vector<1x8x512xf32>,
    return
  }
  func.func @transform_0(%arg0: i32, %arg1: i32) -> (i32, i32, i32) {
    %c0_i32 = arith.constant 0 : i32
    %c0_i32_0 = arith.constant 0 : i32
    %c0_i32_1 = arith.constant 0 : i32
    return %arg0, %c0_i32, %c0_i32_0 : i32, i32, i32
  }
  func.func @transform_1(%arg0: i32, %arg1: i32) -> (i32, i32) {
    %c0_i32 = arith.constant 0 : i32
    %c0_i32_0 = arith.constant 0 : i32
    %c0_i32_1 = arith.constant 0 : i32
    return %c0_i32, %c0_i32_0 : i32, i32
  }
  func.func @transform_2(%arg0: i32, %arg1: i32) -> (i32, i32) {
    %c0_i32 = arith.constant 0 : i32
    %c0_i32_0 = arith.constant 0 : i32
    %c0_i32_1 = arith.constant 0 : i32
    return %c0_i32, %c0_i32_0 : i32, i32
  }
  func.func @transform_3(%arg0: i32, %arg1: i32) -> (i32, i32, i32) {
    %c0_i32 = arith.constant 0 : i32
    %c0_i32_0 = arith.constant 0 : i32
    %c0_i32_1 = arith.constant 0 : i32
    %c0_i32_2 = arith.constant 0 : i32
    return %c0_i32, %c0_i32_0, %c0_i32_1 : i32, i32, i32
  }
  func.func @transform_4(%arg0: i32, %arg1: i32) -> (i32, i32, i32) {
    %c0_i32 = arith.constant 0 : i32
    %c0_i32_0 = arith.constant 0 : i32
    return %arg0, %arg1, %c0_i32 : i32, i32, i32
  }
}

</mosaic_0001>

<bundles_post_ra>
// kernel: tpu_custom_call.1
= control target key start
LH: loop header
LB: loop body
LE: loop exit
PB: predicated region body
PF: predicated region fallthrough
CT: control target
= control target key end

     0   :  { %9 = vsyncpa [#allocation4], 0  ;;  %s3440_s0 = inlined_call_operand.vmem [shape: f32[2,18,288], index: 0, kind: input, shape index: {}]   ;;  %s3441_s1 = inlined_call_operand.vmem [shape: f32[1,288], index: 1, kind: input, shape index: {}]   ;;  %s3442_s2 = inlined_call_operand.vmem [shape: f32[1,288], index: 2, kind: input, shape index: {}]   ;;  %s3443_s3 = inlined_call_operand.hbm [shape: bf16[3,288,512], index: 3, kind: input, shape index: {}]   ;;  %s3444_s4 = inlined_call_operand.hbm [shape: f32[2,16,512], index: 4, kind: output, shape index: {}]  }
   0x1   :  { %10 = vsyncpa [#allocation5], 0 }
   0x2   :  { %12 = vsyncpa [#allocation5 + $0x1], 0  ;;  %s3188_s15 = smov 0   ;;  %s3190_s16 = smov 0  }
   0x3   :  { %s3192_s17 = smov 0   ;;  %s3194_s18 = smov 0  }
   0x4   :  { %s3196_s19 = smov 0   ;;  %s3198_s20 = smov 0  }
   0x5   :  { %s3200_s21 = smov 0   ;;  %s3202_s22 = smov 0  }
   0x6 LB: > { %s2306_s23 = sadd.s32 4294967295, %s3156_s22   ;;  %s2307_s24 = sadd.s32 4294967294, %s3156_s22   ;;  %s3156_s22 = sphi %s3202_s22, %s18_s22   ;;  %s3152_s21 = sphi %s3200_s21, %s3468_s21   ;;  %s3148_s20 = sphi %s3198_s20, %s3467_s20   ;;  %s3144_s19 = sphi %s3196_s19, %s3466_s19   ;;  %s3140_s18 = sphi %s3194_s18, %s3465_s18   ;;  %s3136_s17 = sphi %s3192_s17, %s3464_s17   ;;  %s3132_s16 = sphi %s3190_s16, %s3463_s16   ;;  %s3128_s15 = sphi %s3188_s15, %s3462_s15  }
   0x7   : > { %s27_s25 = sadd.s32 1, %s3148_s20  ;;  %s30_s26 = sadd.s32 1, %s3152_s21 }
   0x8   : > { %p28_p0 = scmp.ge.s32.totalorder %s27_s25, 2  ;;  %s128_s27 = sadd.s32 1, %s3136_s17 }
   0x9   : > { %p138_p1 = scmp.ne.s32.totalorder %s3136_s17, %s3132_s16  ;;  %p139_p2 = scmp.eq.s32.totalorder %s2306_s23, 3 }
   0xa   : > { %s3470_s25 = smov (%p28_p0, %s27_s25), 0  ;;  %s3472_s26 = smov (!%p28_p0, %s30_s26), %s3152_s21 }
   0xb   : > { %s124_s28 = ssub.s32 %s3148_s20, %s3470_s25  ;;  %p3240_p3 = por %p139_p2, %p138_p1 }
   0xc   : > { %p32_p4 = scmp.ge.s32.totalorder %s3472_s26, 2  ;;  %p144_p5 = scmp.ne.s32.totalorder %s3132_s16, %s3128_s15 }
   0xd   : > { %s3449_s29 = scalar_select %p3240_p3, 1, 0 }
   0xe   : > { %p145_p6 = scmp.eq.s32.totalorder %s2307_s24, 3  ;;  %p2308_p7 = scmp.ge.s32.totalorder %s3156_s22, 1 }
   0xf   : > { %s3474_s26 = smov (%p32_p4, %s3472_s26), 0  ;;  %p152_p9 = scmp.lt.s32.totalorder %s3156_s22, 5 }
  0x10   : > { %p3249_p8 = por %p145_p6, %p144_p5  ;;  %s123_s5 = ssub.s32 %s3152_s21, %s3474_s26 }
  0x11   : > { %s125_s6 = sor.u32 %s124_s28, %s123_s5  ;;  %p3256_p10 = pnand %p2308_p7, %p152_p9 }
  0x12   : > { %s3450_s30 = scalar_select %p3249_p8, 1, 0 }
  0x13   : > { %s3451_s7 = scalar_select %p3256_p10, 1, 0 }
  0x14   : > { %p126_p11 = scmp.eq.s32.totalorder %s125_s6, 0  ;;  %p3260_p12 = scmp.eq.s32.totalorder %s2306_s23, 0 }
  0x15   : > { %p2610_p13 = pneg %p3256_p10  ;;  %s3158_s10 = smov [#allocation3]  }
  0x16   : > { %s3452_s8 = scalar_select %p3260_p12, 1, 0 }
  0x17   : > { %s3267_s9 = scalar_select %p126_p11, %s3136_s17, %s128_s27  }
  0x18   : > { %s170_s11 = sshll.u32 %s3158_s10, 4  ;;  %p3271_p0 = pnand %p3260_p12, %p2610_p13  ;;  %s171_s11 = int_to_ptr.vmem [resolvable:$true] %s170_s11 }
  0x19   : > { %s3030_s23 = scalar_lea.hbm %s3443_s3, 27648 }
  0x1a   : > { %p3031_p1 = scmp.ne.s32.totalorder %s3443_s3, %s3030_s23  ;;  %p3032_p2 = pneg %p3271_p0 }
  0x1b   : > { %p3037_p6 = scmp.lt.u32.totalorder %s3030_s23, %s3443_s3 }
  0x1c   : > { %p3033_p4 = pnand %p3032_p2, %p3031_p1 }
  0x1e   : > { %p3034_p5 = pneg %p3033_p4 }
  0x20   : > { %p3039_p7 = pnand %p3037_p6, %p3034_p5 }
  0x22   : > { %3042 = shalt.err (!%p3039_p7)
}
  0x23   : > { %s3043_s6 = scalar_lea.vmem %s171_s11, 27648  ;;  %p3051_p8 = scmp.lt.s32.totalorder %s171_s11, %s171_s11 }
  0x24   : > { %p3044_p9 = scmp.ne.s32.totalorder %s171_s11, %s3043_s6  ;;  %p3052_p3 = scmp.lt.s32.totalorder %s3043_s6, %s3043_s6 }
  0x26   : > { %p3046_p11 = pnand %p3044_p9, %p3032_p2  ;;  %p3053_p12 = por %p3052_p3, %p3051_p8 }
  0x28   : > { %p3047_p13 = pneg %p3046_p11 }
  0x2a   : > { %p3054_p10 = pnand %p3053_p12, %p3047_p13 }
  0x2c   : > { %3057 = shalt.err (!%p3054_p10)
}
  0x2d   : > { %s3159_s10 = smov 256   ;;  %s3160_s13 = smov 16  }
  0x2e   : > { %2613 = dma.hbm_to_vmem [thread:$0]  (!%p3271_p0), %s3443_s3, 27648, %s171_s11, [#allocation4], %s3159_s10, %s3159_s10, %s3160_s13  }
  0x2f   : > { %p3454_p1 = scmp.ne.s32.totalorder %s3451_s7, 0 }
  0x30   : > { %p3455_p4 = scmp.ne.s32.totalorder (!%p3454_p1), %s3452_s8, 0 }
  0x31   : > { %194 = sbr.rel (%p3454_p1) target bundleno = 514 (0x202), region = 36 }
  0x38   : > { %3119 = dma.done.wait (%p3455_p4), [#allocation4], 27648  }
  0x39   : > { %3121 = vsyncadd (%p3455_p4), [#allocation4], 4294939648  ;;  %v2689_v0 = vld [vmem:[#allocation3 + $0x244] ss:$16 sps:$4 sm:$0xff]   ;;  %v2691_v1 = vld [vmem:[#allocation3 + $0x24c] ss:$16 sps:$4 sm:$0xff]   ;;  %v240_v37 = vlaneseq }
  0x3a   : > { %883 = vmatprep.subr.bf16.mxu0 %v2689_v0  ;;  %v2693_v2 = vld [vmem:[#allocation3 + $0x240] ss:$16 sps:$4 sm:$0xff]   ;;  %v2694_v3 = vld [vmem:[#allocation3 + $0x248] ss:$16 sps:$4 sm:$0xff]   ;;  %965 = vmatprep.subr.bf16.mxu1 %v2691_v1  ;;  %v2695_v4 = vld [vmem:[#allocation3 + $0x264] ss:$16 sps:$4 sm:$0xff]  }
  0x3b   : > { %884 = vmatpush1.bf16.msra.mxu0 %v2693_v2  ;;  %966 = vmatpush1.bf16.msra.mxu1 %v2694_v3  ;;  %v2697_v5 = vld [vmem:[#allocation3 + $0x26c] ss:$16 sps:$4 sm:$0xff]   ;;  %v2699_v6 = vld [vmem:[#allocation3 + $0x260] ss:$16 sps:$4 sm:$0xff]   ;;  %v2700_v7 = vld [vmem:[#allocation3 + $0x268] ss:$16 sps:$4 sm:$0xff]  }
  0x3c   : > { %885 = vmatprep.subr.bf16.mxu0 %v2695_v4  ;;  %967 = vmatprep.subr.bf16.mxu1 %v2697_v5  ;;  %v2701_v8 = vld [vmem:[#allocation3 + $0x284] ss:$16 sps:$4 sm:$0xff]   ;;  %v2703_v9 = vld [vmem:[#allocation3 + $0x28c] ss:$16 sps:$4 sm:$0xff]   ;;  %v2705_v10 = vld [vmem:[#allocation3 + $0x280] ss:$16 sps:$4 sm:$0xff]  }
  0x3d   : > { %v2706_v11 = vld [vmem:[#allocation3 + $0x288] ss:$16 sps:$4 sm:$0xff]   ;;  %v2707_v12 = vld [vmem:[#allocation3 + $0x2a4] ss:$16 sps:$4 sm:$0xff]   ;;  %v2709_v13 = vld [vmem:[#allocation3 + $0x2ac] ss:$16 sps:$4 sm:$0xff]  }
  0x3e   : > { %v2711_v14 = vld [vmem:[#allocation3 + $0x2a0] ss:$16 sps:$4 sm:$0xff]   ;;  %v2712_v15 = vld [vmem:[#allocation3 + $0x2a8] ss:$16 sps:$4 sm:$0xff]   ;;  %v2713_v16 = vld [vmem:[#allocation3 + $0x2c4] ss:$16 sps:$4 sm:$0xff]  }
  0x3f   : > { %886 = vmatpush1.bf16.msra.mxu0 %v2699_v6  ;;  %968 = vmatpush1.bf16.msra.mxu1 %v2700_v7  ;;  %v2715_v17 = vld [vmem:[#allocation3 + $0x2cc] ss:$16 sps:$4 sm:$0xff]   ;;  %v2717_v18 = vld [vmem:[#allocation3 + $0x2c0] ss:$16 sps:$4 sm:$0xff]   ;;  %v2718_v19 = vld [vmem:[#allocation3 + $0x2c8] ss:$16 sps:$4 sm:$0xff]  }
  0x40   : > { %887 = vmatprep.subr.bf16.mxu0 %v2701_v8  ;;  %969 = vmatprep.subr.bf16.mxu1 %v2703_v9  ;;  %v2719_v20 = vld [vmem:[#allocation3 + $0x2e4] ss:$16 sps:$4 sm:$0xff]   ;;  %v2721_v21 = vld [vmem:[#allocation3 + $0x2ec] ss:$16 sps:$4 sm:$0xff]   ;;  %v2723_v22 = vld [vmem:[#allocation3 + $0x2e0] ss:$16 sps:$4 sm:$0xff]  }
  0x41   : > { %v2724_v23 = vld [vmem:[#allocation3 + $0x2e8] ss:$16 sps:$4 sm:$0xff]   ;;  %v2725_v24 = vld [vmem:[#allocation3 + $0x304] ss:$16 sps:$4 sm:$0xff]   ;;  %v2727_v25 = vld [vmem:[#allocation3 + $0x30c] ss:$16 sps:$4 sm:$0xff]  }
  0x42   : > { %v2729_v26 = vld [vmem:[#allocation3 + $0x300] ss:$16 sps:$4 sm:$0xff]   ;;  %v2730_v27 = vld [vmem:[#allocation3 + $0x308] ss:$16 sps:$4 sm:$0xff]   ;;  %v2731_v28 = vld [vmem:[#allocation3 + $0x324] ss:$16 sps:$4 sm:$0xff]  }
  0x43   : > { %888 = vmatpush1.bf16.msra.mxu0 %v2705_v10  ;;  %970 = vmatpush1.bf16.msra.mxu1 %v2706_v11  ;;  %v2733_v29 = vld [vmem:[#allocation3 + $0x32c] ss:$16 sps:$4 sm:$0xff]   ;;  %p220_p3 = scmp.lt.s32.totalorder %s3144_s19, 1  ;;  %v2735_v30 = vld [vmem:[#allocation3 + $0x320] ss:$16 sps:$4 sm:$0xff]   ;;  %s2315_s8 = sshll.u32 %s3140_s18, 3 }
  0x44   : > { %889 = vmatprep.subr.bf16.mxu0 %v2707_v12  ;;  %971 = vmatprep.subr.bf16.mxu1 %v2709_v13  ;;  %v2736_v31 = vld [vmem:[#allocation3 + $0x328] ss:$16 sps:$4 sm:$0xff]   ;;  %v2737_v32 = vld [vmem:[#allocation3 + $0x344] ss:$16 sps:$4 sm:$0xff]   ;;  %v2739_v33 = vld [vmem:[#allocation3 + $0x34c] ss:$16 sps:$4 sm:$0xff]   ;;  %v293_v45 = vstv %s2315_s8 }
  0x45   : > { %s221_s7 = scalar_select %p220_p3, %s3144_s19, 1  ;;  %v2741_v34 = vld [vmem:[#allocation3 + $0x340] ss:$16 sps:$4 sm:$0xff]   ;;  %v2742_v35 = vld [vmem:[#allocation3 + $0x348] ss:$16 sps:$4 sm:$0xff]   ;;  %v241_v42 = vshrl.u32 %v240_v37, 7 }
  0x46   : > { %v2743_v36 = vld [vmem:[#allocation3 + $0x364] ss:$16 sps:$4 sm:$0xff]   ;;  %v2745_v38 = vld [vmem:[#allocation3 + $0x36c] ss:$16 sps:$4 sm:$0xff]   ;;  %s227_s12 = sshra.s32 %s2315_s8, 3  ;;  %vm329_vm4 = vcmask 257024  }
  0x47   : > { %890 = vmatpush1.bf16.msra.mxu0 %v2711_v14  ;;  %972 = vmatpush1.bf16.msra.mxu1 %v2712_v15  ;;  %s2603_s11 = smul.u32 72, %s221_s7  ;;  %v2747_v39 = vld [vmem:[#allocation3 + $0x360] ss:$16 sps:$4 sm:$0xff]   ;;  %v2748_v40 = vld [vmem:[#allocation3 + $0x368] ss:$16 sps:$4 sm:$0xff]   ;;  %v292_v44 = vadd.s32 8, %v241_v42  ;;  %v294_v48 = vadd.s32 %v293_v45, %v241_v42 }
  0x48   : > { %891 = vmatprep.subr.bf16.mxu0 %v2713_v16  ;;  %973 = vmatprep.subr.bf16.mxu1 %v2715_v17  ;;  %v2749_v41 = vld [vmem:[#allocation3 + $0x384] ss:$16 sps:$4 sm:$0xff]   ;;  %v2751_v43 = vld [vmem:[#allocation3 + $0x38c] ss:$16 sps:$4 sm:$0xff]   ;;  %s2558_s23 = smul.u32 24, %s227_s12  ;;  %v242_v50 = vsub.s32 0, %v241_v42 }
  0x49   : > { %s224_s5 = scalar_lea.vmem %s3440_s0, %s2603_s11  ;;  %v2753_v46 = vld [vmem:[#allocation3 + $0x380] ss:$16 sps:$4 sm:$0xff]   ;;  %v2754_v47 = vld [vmem:[#allocation3 + $0x388] ss:$16 sps:$4 sm:$0xff]   ;;  %v2755_v49 = vld [vmem:[#allocation3 + $0x3a4] ss:$16 sps:$4 sm:$0xff]   ;;  %v295_v56 = vadd.s32 %v293_v45, %v292_v44 }
  0x4a   : > { %v2757_v51 = vld [vmem:[#allocation3 + $0x3ac] ss:$16 sps:$4 sm:$0xff]   ;;  %s231_s6 = scalar_lea.vmem %s224_s5, %s2558_s23  ;;  %v246_v52 = vsub.s32 1, %v241_v42  ;;  %v250_v53 = vsub.s32 2, %v241_v42  ;;  %v2759_v54 = vld [vmem:[#allocation3 + $0x3a0] ss:$16 sps:$4 sm:$0xff]  }
  0x4b   : > { %892 = vmatpush1.bf16.msra.mxu0 %v2717_v18  ;;  %974 = vmatpush1.bf16.msra.mxu1 %v2718_v19  ;;  %v2760_v55 = vld [vmem:[#allocation3 + $0x3a8] ss:$16 sps:$4 sm:$0xff]   ;;  %v2761_v57 = vld [vmem:[#allocation3 + $0x3c4] ss:$16 sps:$4 sm:$0xff]   ;;  %v2763_v58 = vld [vmem:[#allocation3 + $0x3cc] ss:$16 sps:$4 sm:$0xff]  }
  0x4c   : > { %893 = vmatprep.subr.bf16.mxu0 %v2719_v20  ;;  %975 = vmatprep.subr.bf16.mxu1 %v2721_v21  ;;  %v232_v59 = vld [vmem:[%s231_s6] sm:$0xff]  ;;  %v233_v60 = vld [vmem:[%s231_s6 + $0x8] sm:$0xff]  ;;  %v234_v61 = vld [vmem:[%s231_s6 + $0x10] sm:$0xff]  ;;  %vm296_vm0 = vcmp.ge.s32.totalorder %v294_v48, 1  ;;  %vm298_vm1 = vcmp.lt.s32.totalorder %v294_v48, 17  ;;  %vm297_vm2 = vcmp.ge.s32.totalorder %v295_v56, 1 }
  0x4d   : > { %v235_v62 = vld [vmem:[%s231_s6 + $0x18] sm:$0x3]  ;;  %v236_v63 = vld [vmem:[%s231_s6 + $0x20] sm:$0x3]  ;;  %v237_v1 = vld [vmem:[%s231_s6 + $0x28] sm:$0x3] }
  0x4e   : > { %v238_v0 = vld [vmem:[%s3441_s1] sm:$0x7]  ;;  %v2765_v13 = vld [vmem:[#allocation3 + $0x3c0] ss:$16 sps:$4 sm:$0xff]   ;;  %vm299_vm3 = vcmp.lt.s32.totalorder %v295_v56, 17  ;;  %vm3311_vm5 = vmand %vm296_vm0, %vm298_vm1  ;;  %vm332_vm6 = vcmask 253952  }
  0x4f   : > { %894 = vmatpush1.bf16.msra.mxu0 %v2723_v22  ;;  %976 = vmatpush1.bf16.msra.mxu1 %v2724_v23  ;;  %v243_v2 = vrot.slane %v238_v0, %v242_v50  ;;  %v247_v3 = vrot.slane %v238_v0, %v246_v52  ;;  %v251_v4 = vrot.slane %v238_v0, %v250_v53  ;;  %v261_v5 = vld [vmem:[%s3442_s2] sm:$0x7]  ;;  %v2767_v17 = vld [vmem:[#allocation3 + $0x3e4] ss:$16 sps:$4 sm:$0xff]   ;;  %v2769_v18 = vld [vmem:[#allocation3 + $0x3ec] ss:$16 sps:$4 sm:$0xff]  }
  0x50   : > { %895 = vmatprep.subr.bf16.mxu0 %v2725_v24  ;;  %977 = vmatprep.subr.bf16.mxu1 %v2727_v25  ;;  %v266_v6 = vrot.slane %v261_v5, %v242_v50  ;;  %v270_v7 = vrot.slane %v261_v5, %v246_v52  ;;  %v274_v8 = vrot.slane %v261_v5, %v250_v53  ;;  %v2766_v14 = vld [vmem:[#allocation3 + $0x3c8] ss:$16 sps:$4 sm:$0xff]   ;;  %v2771_v22 = vld [vmem:[#allocation3 + $0x3e0] ss:$16 sps:$4 sm:$0xff]   ;;  %vm301_vm7 = vmand %vm297_vm2, %vm299_vm3  ;;  %vm879_vm8 = vcmask 261120   ;;  %s217_s7 = sand.u32 1, %s3132_s16  }
  0x51   : > { %v255_v9 = vmul.f32 %v243_v2, %v232_v59  ;;  %v256_v10 = vmul.f32 %v247_v3, %v233_v60  ;;  %v257_v11 = vmul.f32 %v251_v4, %v234_v61  ;;  %v258_v12 = vmul.f32 %v243_v2, %v235_v62  ;;  %v2779_v48 = vld [vmem:[#allocation3 + $0x424] ss:$16 sps:$4 sm:$0xff]   ;;  %v2783_v50 = vld [vmem:[#allocation3 + $0x420] ss:$16 sps:$4 sm:$0xff]   ;;  %v2790_v53 = vld [vmem:[#allocation3 + $0x44c] ss:$16 sps:$4 sm:$0xff]  }
  0x52   : > { %v259_v15 = vmul.f32 %v247_v3, %v236_v63  ;;  %v260_v16 = vmul.f32 %v251_v4, %v237_v1  ;;  %v2787_v52 = vld [vmem:[#allocation3 + $0x444] ss:$16 sps:$4 sm:$0xff]   ;;  %v2785_v4 = vld [vmem:[#allocation3 + $0x440] ss:$16 sps:$4 sm:$0xff]   ;;  %v2788_v5 = vld [vmem:[#allocation3 + $0x448] ss:$16 sps:$4 sm:$0xff]  }
  0x53   : > { %896 = vmatpush1.bf16.msra.mxu0 %v2729_v26  ;;  %978 = vmatpush1.bf16.msra.mxu1 %v2730_v27  ;;  %v278_v19 = vadd.f32 %v266_v6, %v255_v9  ;;  %v279_v20 = vadd.f32 %v270_v7, %v256_v10  ;;  %v280_v21 = vadd.f32 %v274_v8, %v257_v11  ;;  %v2772_v27 = vld [vmem:[#allocation3 + $0x3e8] ss:$16 sps:$4 sm:$0xff]   ;;  %v2791_v9 = vld [vmem:[#allocation3 + $0x460] ss:$16 sps:$4 sm:$0xff]   ;;  %v2799_v11 = vld [vmem:[#allocation3 + $0x4] ss:$16 sps:$4 sm:$0xff]  }
  0x54   : > { %897 = vmatprep.subr.bf16.mxu0 %v2731_v28  ;;  %979 = vmatprep.subr.bf16.mxu1 %v2733_v29  ;;  %v281_v23 = vadd.f32 %v266_v6, %v258_v12  ;;  %v282_v24 = vadd.f32 %v270_v7, %v259_v15  ;;  %v283_v25 = vadd.f32 %v274_v8, %v260_v16  ;;  %v2793_v6 = vld [vmem:[#allocation3 + $0x464] ss:$16 sps:$4 sm:$0xff]   ;;  %v2796_v7 = vld [vmem:[#allocation3 + $0x46c] ss:$16 sps:$4 sm:$0xff]   ;;  %v2794_v10 = vld [vmem:[#allocation3 + $0x468] ss:$16 sps:$4 sm:$0xff]  }
  0x55   : > { %v3315_v28 = vmax.f32 %v278_v19, 0.0  ;;  %v3317_v29 = vmax.f32 %v279_v20, 0.0  ;;  %v2802_v12 = vld [vmem:[#allocation3 + $0xc] ss:$16 sps:$4 sm:$0xff]   ;;  %v2806_v19 = vld [vmem:[#allocation3 + $0x24] ss:$16 sps:$4 sm:$0xff]   ;;  %vm3348_vm9 = vmpackc.low %vm3311_vm5, %vm3311_vm5 }
  0x56   : > { %v2809_v20 = vld [vmem:[#allocation3 + $0x2c] ss:$16 sps:$4 sm:$0xff]   ;;  %v2818_v26 = vld [vmem:[#allocation3 + $0x64] ss:$16 sps:$4 sm:$0xff]   ;;  %s2313_s8 = sshll.u32 %s217_s7, 5  ;;  %s2553_s11 = sshll.u32 %s3140_s18, 2 }
  0x57   : > { %898 = vmatpush1.bf16.msra.mxu0 %v2735_v30  ;;  %980 = vmatpush1.bf16.msra.mxu1 %v2736_v31  ;;  %v286_v30 = vmax.f32 %v280_v21, 0.0  ;;  %v2773_v31 = vld [vmem:[#allocation3 + $0x404] ss:$16 sps:$4 sm:$0xff]   ;;  %v303_v37 = vsel %vm3311_vm5, %v3317_v29, 0.0  ;;  %v2804_v21 = vld [vmem:[#allocation3 + $0x20] ss:$16 sps:$4 sm:$0xff]  }
  0x58   : > { %899 = vmatprep.subr.bf16.mxu0 %v2737_v32  ;;  %981 = vmatprep.subr.bf16.mxu1 %v2739_v33  ;;  %v287_v32 = vmax.f32 %v281_v23, 0.0  ;;  %v288_v33 = vmax.f32 %v282_v24, 0.0  ;;  %v2812_v23 = vld [vmem:[#allocation3 + $0x44] ss:$16 sps:$4 sm:$0xff]   ;;  %v2815_v24 = vld [vmem:[#allocation3 + $0x4c] ss:$16 sps:$4 sm:$0xff]  }
  0x59   : > { %s2554_s12 = sshll.u32 %s3144_s19, 3  ;;  %s219_s28 = scalar_lea.vmem [#allocation6], %s2313_s8 }
  0x5a   : > { %s2215_s23 = sadd.s32 %s2554_s12, %s2553_s11  ;;  %s2219_s27 = sshll.u32 %s219_s28, 4  ;;  %s3384_s27 = int_to_ptr.vmem [resolvable:$true] %s2219_s27 }
  0x5b   : > { %900 = vmatpush1.bf16.msra.mxu0 %v2741_v34  ;;  %982 = vmatpush1.bf16.msra.mxu1 %v2742_v35  ;;  %v289_v34 = vmax.f32 %v283_v25, 0.0  ;;  %v2775_v35 = vld [vmem:[#allocation3 + $0x40c] ss:$16 sps:$4 sm:$0xff]   ;;  %s2555_s5 = sshll.u32 %s2215_s23, 7  ;;  %s2203_s18 = scalar_lea.sflag [#allocation5], %s217_s7 }
  0x5c   : > { %901 = vmatprep.subr.bf16.mxu0 %v2743_v36  ;;  %983 = vmatprep.subr.bf16.mxu1 %v2745_v38  ;;  %v302_v36 = vsel %vm3311_vm5, %v3315_v28, 0.0  ;;  %v304_v38 = vsel %vm3311_vm5, %v286_v30, 0.0  ;;  %v2810_v30 = vld [vmem:[#allocation3 + $0x40] ss:$16 sps:$4 sm:$0xff]   ;;  %s3389_s13 = scalar_lea.hbm %s3444_s4, %s2555_s5  ;;  %s3058_s19 = scalar_lea.vmem %s3384_s27, 512 }
  0x5d   : > { %v2559_v42 = vpack.c.bf16 %v303_v37, %v302_v36  ;;  %v2822_v36 = vld [vmem:[#allocation3 + $0x80] ss:$16 sps:$4 sm:$0xff]   ;;  %v2825_v37 = vld [vmem:[#allocation3 + $0x88] ss:$16 sps:$4 sm:$0xff]   ;;  %p3059_p8 = scmp.ne.s32.totalorder %s3384_s27, %s3058_s19  ;;  %p3460_p10 = scmp.ne.s32.totalorder %s3449_s29, 0 }
  0x5e   : > { %s3162_s14 = smov [#allocation6]  }
  0x5f   : > { %902 = vmatpush1.bf16.msra.mxu0 %v2747_v39  ;;  %984 = vmatpush1.bf16.msra.mxu1 %v2748_v40  ;;  %v305_v39 = vsel %vm301_vm7, %v287_v32, 0.0  ;;  %v306_v40 = vsel %vm301_vm7, %v288_v33, 0.0  ;;  %328 = vst [vmem:[#allocation2] sm:$0xff] %v2559_v42  ;;  %v2821_v32 = vld [vmem:[#allocation3 + $0x6c] ss:$16 sps:$4 sm:$0xff]   ;;  %p3060_p12 = pnand %p3059_p8, %p3460_p10  ;;  %s3062_s24 = sshll.u32 %s3162_s14, 4  ;;  %s3063_s24 = int_to_ptr.vmem [resolvable:$false] %s3062_s24 }
  0x60   : > { %903 = vmatprep.subr.bf16.mxu0 %v2749_v41  ;;  %985 = vmatprep.subr.bf16.mxu1 %v2751_v43  ;;  %v307_v41 = vsel %vm301_vm7, %v289_v34, 0.0  ;;  %v2560_v43 = vpack.c.bf16 %v304_v38, %v304_v38  ;;  %v2561_v44 = vpack.c.bf16 %v306_v40, %v305_v39  ;;  %v2816_v33 = vld [vmem:[#allocation3 + $0x60] ss:$16 sps:$4 sm:$0xff]   ;;  %v2819_v34 = vld [vmem:[#allocation3 + $0x68] ss:$16 sps:$4 sm:$0xff]   ;;  %s3064_s8 = scalar_lea.vmem %s3063_s24, 1024  ;;  %p3065_p2 = scmp.lt.s32.totalorder %s3384_s27, %s3063_s24 }
  0x61   : > { %v2562_v45 = vpack.c.bf16 %v307_v41, %v307_v41  ;;  %v2830_v38 = vld [vmem:[#allocation3 + $0xa4] ss:$16 sps:$4 sm:$0xff]   ;;  %v2833_v39 = vld [vmem:[#allocation3 + $0xac] ss:$16 sps:$4 sm:$0xff]   ;;  %v2828_v40 = vld [vmem:[#allocation3 + $0xa0] ss:$16 sps:$4 sm:$0xff]   ;;  %p3061_p0 = pneg %p3060_p12  ;;  %p3066_p5 = scmp.lt.s32.totalorder %s3064_s8, %s3058_s19 }
  0x62   : > { %331 = vst [vmem:[#allocation2 + $0xc] sm:$0x11] %v2561_v44  ;;  %330 = vst.msk [vmem:[#allocation2 + $0x8] sm:$0xf] %vm329_vm4, %v2560_v43  ;;  %v2831_v41 = vld [vmem:[#allocation3 + $0xa8] ss:$16 sps:$4 sm:$0xff]  }
  0x63   : > { %904 = vmatpush1.bf16.msra.mxu0 %v2753_v46  ;;  %986 = vmatpush1.bf16.msra.mxu1 %v2754_v47  ;;  %v2777_v46 = vld [vmem:[#allocation3 + $0x400] ss:$16 sps:$4 sm:$0xff]   ;;  %v2778_v47 = vld [vmem:[#allocation3 + $0x408] ss:$16 sps:$4 sm:$0xff]   ;;  %333 = vst.msk [vmem:[#allocation2 + $0x14] sm:$0x1] %vm332_vm6, %v2562_v45  ;;  %p3067_p6 = por %p3066_p5, %p3065_p2 }
  0x64   : > { %905 = vmatprep.subr.bf16.mxu0 %v2755_v49  ;;  %987 = vmatprep.subr.bf16.mxu1 %v2757_v51  ;;  %v2781_v49 = vld [vmem:[#allocation3 + $0x42c] ss:$16 sps:$4 sm:$0xff]   ;;  %v2784_v51 = vld [vmem:[#allocation3 + $0x428] ss:$16 sps:$4 sm:$0xff]   ;;  %v2834_v44 = vld [vmem:[#allocation3 + $0xc0] ss:$16 sps:$4 sm:$0xff]  }
  0x65   : > { %v2839_v43 = vld [vmem:[#allocation3 + $0xcc] ss:$16 sps:$4 sm:$0xff]   ;;  %v2837_v45 = vld [vmem:[#allocation3 + $0xc8] ss:$16 sps:$4 sm:$0xff]   ;;  %p3068_p7 = pnand %p3067_p6, %p3061_p0 }
  0x67   : > { %906 = vmatpush1.bf16.msra.mxu0 %v2759_v54  ;;  %988 = vmatpush1.bf16.msra.mxu1 %v2760_v55 }
  0x68   : > { %907 = vmatprep.subr.bf16.mxu0 %v2761_v57  ;;  %989 = vmatprep.subr.bf16.mxu1 %v2763_v58 }
  0x69   : > { %v3331_v54 = vld [vmem:[#allocation2 + $0xc] sm:$0x11]  ;;  %v3335_v57 = vld [vmem:[#allocation2 + $0x8] sm:$0xf] }
  0x6a   : > { %v2322_v55 = vcombine.high %v2559_v42, %v3331_v54  ;;  %v2321_v56 = vcombine.low %v2559_v42, %v3331_v54  ;;  %v3337_v58 = vld [vmem:[#allocation2 + $0x14] sm:$0x1]  ;;  %v2836_v42 = vld [vmem:[#allocation3 + $0xc4] ss:$16 sps:$4 sm:$0xff]   ;;  %v2400_v25 = vcombine.low %v3335_v57, %v3335_v57 }
  0x6b   : > { %908 = vmatpush1.bf16.msra.mxu0 %v2765_v13  ;;  %990 = vmatpush1.bf16.msra.mxu1 %v2766_v14  ;;  %v2323_v1 = vcombine.low %v3335_v57, %v3337_v58  ;;  %v3161_v13 = vmov 0   ;;  %v2919_v57 = vld [vmem:[#allocation3 + $0x4c0] ss:$16 sps:$4 sm:$0xff]  }
  0x6c   : > { %909 = vmatprep.subr.bf16.mxu0 %v2767_v17  ;;  %991 = vmatprep.subr.bf16.mxu1 %v2769_v18  ;;  %v504_v59 = vshrl.u32 %v2322_v55, 16  ;;  %v506_v60 = vshll.u32 %v2322_v55, 16  ;;  %v497_v61 = vshrl.u32 %v2321_v56, 16  ;;  %v499_v62 = vshll.u32 %v2321_v56, 16  ;;  %v2797_v17 = vld [vmem:[#allocation3] ss:$16 sps:$4 sm:$0xff]  }
  0x6d   : > { %v513_v8 = vshll.u32 %v2323_v1, 16  ;;  %v511_v14 = vshrl.u32 %v2323_v1, 16  ;;  %v2800_v18 = vld [vmem:[#allocation3 + $0x8] ss:$16 sps:$4 sm:$0xff]   ;;  %v2854_v55 = vld [vmem:[#allocation3 + $0x124] ss:$16 sps:$4 sm:$0xff]  }
  0x6e   : > { %v508_v63 = vrot.slane %v506_v60, 1  ;;  %v501_v0 = vrot.slane %v499_v62, 1  ;;  %v2857_v56 = vld [vmem:[#allocation3 + $0x12c] ss:$16 sps:$4 sm:$0xff]   ;;  %v2855_v60 = vld [vmem:[#allocation3 + $0x128] ss:$16 sps:$4 sm:$0xff]  }
  0x6f   : > { %910 = vmatpush1.bf16.msra.mxu0 %v2771_v22  ;;  %992 = vmatpush1.bf16.msra.mxu1 %v2772_v27  ;;  %v515_v15 = vrot.slane %v513_v8, 1  ;;  %v2807_v22 = vld [vmem:[#allocation3 + $0x28] ss:$16 sps:$4 sm:$0xff]   ;;  %v3018_v27 = vpack.c.bf16 %v3317_v29, %v3317_v29  ;;  %v2824_v29 = vld [vmem:[#allocation3 + $0x84] ss:$16 sps:$4 sm:$0xff]  }
  0x70   : > { %911 = vmatprep.subr.bf16.mxu0 %v2773_v31  ;;  %993 = vmatprep.subr.bf16.mxu1 %v2775_v35  ;;  %v509_v2 = vor.u32 %v508_v63, %v504_v59  ;;  %v502_v3 = vor.u32 %v501_v0, %v497_v61  ;;  %v2813_v31 = vld [vmem:[#allocation3 + $0x48] ss:$16 sps:$4 sm:$0xff]   ;;  %v2827_v35 = vld [vmem:[#allocation3 + $0x8c] ss:$16 sps:$4 sm:$0xff]   ;;  %v2852_v59 = vld [vmem:[#allocation3 + $0x120] ss:$16 sps:$4 sm:$0xff]  }
  0x71   : > { %v516_v16 = vor.u32 %v515_v15, %v511_v14  ;;  %v2860_v61 = vld [vmem:[#allocation3 + $0x144] ss:$16 sps:$4 sm:$0xff]   ;;  %v2863_v62 = vld [vmem:[#allocation3 + $0x14c] ss:$16 sps:$4 sm:$0xff]   ;;  %v2858_v63 = vld [vmem:[#allocation3 + $0x140] ss:$16 sps:$4 sm:$0xff]  }
  0x72   : > { %915 = vmatprep.mubr.bf16.mxu0 %v509_v2  ;;  %997 = vmatprep.mubr.bf16.mxu1 %v509_v2  ;;  %v2861_v0 = vld [vmem:[#allocation3 + $0x148] ss:$16 sps:$4 sm:$0xff]   ;;  %v2866_v1 = vld [vmem:[#allocation3 + $0x164] ss:$16 sps:$4 sm:$0xff]   ;;  %v2869_v2 = vld [vmem:[#allocation3 + $0x16c] ss:$16 sps:$4 sm:$0xff]  }
  0x73   : > { %912 = vmatpush1.bf16.msra.mxu0 %v2777_v46  ;;  %994 = vmatpush1.bf16.msra.mxu1 %v2778_v47  ;;  %v2842_v46 = vld [vmem:[#allocation3 + $0xe4] ss:$16 sps:$4 sm:$0xff]   ;;  %v2845_v47 = vld [vmem:[#allocation3 + $0xec] ss:$16 sps:$4 sm:$0xff]   ;;  %v2873_v8 = vld [vmem:[#allocation3 + $0x188] ss:$16 sps:$4 sm:$0xff]  }
  0x74   : > { %913 = vmatprep.subr.bf16.mxu0 %v2779_v48  ;;  %995 = vmatprep.subr.bf16.mxu1 %v2781_v49  ;;  %v2840_v48 = vld [vmem:[#allocation3 + $0xe0] ss:$16 sps:$4 sm:$0xff]   ;;  %v2843_v49 = vld [vmem:[#allocation3 + $0xe8] ss:$16 sps:$4 sm:$0xff]   ;;  %v2884_v14 = vld [vmem:[#allocation3 + $0x1c4] ss:$16 sps:$4 sm:$0xff]  }
  0x75   : > { %v2887_v15 = vld [vmem:[#allocation3 + $0x1cc] ss:$16 sps:$4 sm:$0xff]  }
  0x77   : > { %914 = vmatpush1.bf16.msra.mxu0 %v2783_v50  ;;  %996 = vmatpush1.bf16.msra.mxu1 %v2784_v51  ;;  %v2848_v50 = vld [vmem:[#allocation3 + $0x104] ss:$16 sps:$4 sm:$0xff]   ;;  %v2851_v51 = vld [vmem:[#allocation3 + $0x10c] ss:$16 sps:$4 sm:$0xff]  }
  0x78   : > { %924 = vmatprep.subr.bf16.mxu0 %v2787_v52  ;;  %1006 = vmatprep.subr.bf16.mxu1 %v2790_v53  ;;  %v2846_v52 = vld [vmem:[#allocation3 + $0x100] ss:$16 sps:$4 sm:$0xff]   ;;  %v2849_v53 = vld [vmem:[#allocation3 + $0x108] ss:$16 sps:$4 sm:$0xff]  }
  0x7a   : > { %916 = vmatmul.mubr.bf16.vlgmr.msra.gmra.mrb[0].mxu0 %v502_v3  ;;  %998 = vmatmul.mubr.bf16.vlgmr.msra.gmra.mrb[0].mxu1 %v502_v3  ;;  %v2864_v3 = vld [vmem:[#allocation3 + $0x160] ss:$16 sps:$4 sm:$0xff]  }
  0x7b   : > { %925 = vmatpush1.bf16.msra.mxu0 %v2785_v4  ;;  %1007 = vmatpush1.bf16.msra.mxu1 %v2788_v5  ;;  %v2867_v4 = vld [vmem:[#allocation3 + $0x168] ss:$16 sps:$4 sm:$0xff]   ;;  %v2872_v5 = vld [vmem:[#allocation3 + $0x184] ss:$16 sps:$4 sm:$0xff]  }
  0x7c   : > { %926 = vmatprep.subr.bf16.mxu0 %v2793_v6  ;;  %1008 = vmatprep.subr.bf16.mxu1 %v2796_v7  ;;  %v2875_v6 = vld [vmem:[#allocation3 + $0x18c] ss:$16 sps:$4 sm:$0xff]   ;;  %v2870_v7 = vld [vmem:[#allocation3 + $0x180] ss:$16 sps:$4 sm:$0xff]  }
  0x7d   : > { %956 = vmatprep.mubr.bf16.mxu0 %v3161_v13  ;;  %1038 = vmatprep.mubr.bf16.mxu1 %v3161_v13 }
  0x7f   : > { %927 = vmatpush1.bf16.msra.mxu0 %v2791_v9  ;;  %1009 = vmatpush1.bf16.msra.mxu1 %v2794_v10  ;;  %v2878_v9 = vld [vmem:[#allocation3 + $0x1a4] ss:$16 sps:$4 sm:$0xff]   ;;  %v2881_v10 = vld [vmem:[#allocation3 + $0x1ac] ss:$16 sps:$4 sm:$0xff]  }
  0x80   : > { %1415 = vmatprep.subr.bf16.mxu0 %v2799_v11  ;;  %1497 = vmatprep.subr.bf16.mxu1 %v2802_v12  ;;  %v2876_v11 = vld [vmem:[#allocation3 + $0x1a0] ss:$16 sps:$4 sm:$0xff]   ;;  %v2879_v12 = vld [vmem:[#allocation3 + $0x1a8] ss:$16 sps:$4 sm:$0xff]  }
  0x86   : > { %2396 = vmatmul.mubr.msk.bf16.vlgmr.msra.gmra.mrb[0].mxu0 %vm879_vm8, %v516_v16  ;;  %2397 = vmatmul.mubr.msk.bf16.vlgmr.msra.gmra.mrb[0].mxu1 %vm879_vm8, %v516_v16  ;;  %v2882_v16 = vld [vmem:[#allocation3 + $0x1c0] ss:$16 sps:$4 sm:$0xff]  }
  0x87   : > { %1416 = vmatpush1.bf16.msra.mxu0 %v2797_v17  ;;  %1498 = vmatpush1.bf16.msra.mxu1 %v2800_v18  ;;  %v2885_v17 = vld [vmem:[#allocation3 + $0x1c8] ss:$16 sps:$4 sm:$0xff]   ;;  %v2890_v18 = vld [vmem:[#allocation3 + $0x1e4] ss:$16 sps:$4 sm:$0xff]  }
  0x88   : > { %1417 = vmatprep.subr.bf16.mxu0 %v2806_v19  ;;  %1499 = vmatprep.subr.bf16.mxu1 %v2809_v20  ;;  %v2893_v19 = vld [vmem:[#allocation3 + $0x1ec] ss:$16 sps:$4 sm:$0xff]   ;;  %v2888_v20 = vld [vmem:[#allocation3 + $0x1e0] ss:$16 sps:$4 sm:$0xff]  }
  0x89   : > { %3019 = vmatprep.mubr.msk.bf16.mxu0 %vm3348_vm9, %v3018_v27  ;;  %3022 = vmatprep.mubr.msk.bf16.mxu1 %vm3348_vm9, %v3018_v27  ;;  %v2897_v27 = vld [vmem:[#allocation3 + $0x208] ss:$16 sps:$4 sm:$0xff]  }
  0x8b   : > { %1418 = vmatpush1.bf16.msra.mxu0 %v2804_v21  ;;  %1500 = vmatpush1.bf16.msra.mxu1 %v2807_v22  ;;  %v2891_v21 = vld [vmem:[#allocation3 + $0x1e8] ss:$16 sps:$4 sm:$0xff]   ;;  %v2896_v22 = vld [vmem:[#allocation3 + $0x204] ss:$16 sps:$4 sm:$0xff]  }
  0x8c   : > { %1419 = vmatprep.subr.bf16.mxu0 %v2812_v23  ;;  %1501 = vmatprep.subr.bf16.mxu1 %v2815_v24  ;;  %v2899_v23 = vld [vmem:[#allocation3 + $0x20c] ss:$16 sps:$4 sm:$0xff]   ;;  %v2894_v24 = vld [vmem:[#allocation3 + $0x200] ss:$16 sps:$4 sm:$0xff]  }
  0x8f   : > { %1420 = vmatpush1.bf16.msra.mxu0 %v2810_v30  ;;  %1502 = vmatpush1.bf16.msra.mxu1 %v2813_v31  ;;  %v2902_v30 = vld [vmem:[#allocation3 + $0x224] ss:$16 sps:$4 sm:$0xff]   ;;  %v2905_v31 = vld [vmem:[#allocation3 + $0x22c] ss:$16 sps:$4 sm:$0xff]  }
  0x90   : > { %1421 = vmatprep.subr.bf16.mxu0 %v2818_v26  ;;  %1503 = vmatprep.subr.bf16.mxu1 %v2821_v32  ;;  %v3025_v26 = vpack.c.bf16 %v3315_v28, %v3315_v28  ;;  %v2900_v32 = vld [vmem:[#allocation3 + $0x220] ss:$16 sps:$4 sm:$0xff]  }
  0x93   : > { %1422 = vmatpush1.bf16.msra.mxu0 %v2816_v33  ;;  %1504 = vmatpush1.bf16.msra.mxu1 %v2819_v34  ;;  %v2903_v33 = vld [vmem:[#allocation3 + $0x228] ss:$16 sps:$4 sm:$0xff]   ;;  %v2908_v34 = vld [vmem:[#allocation3 + $0x484] ss:$16 sps:$4 sm:$0xff]  }
  0x94   : > { %1423 = vmatprep.subr.bf16.mxu0 %v2824_v29  ;;  %1505 = vmatprep.subr.bf16.mxu1 %v2827_v35  ;;  %v2911_v29 = vld [vmem:[#allocation3 + $0x48c] ss:$16 sps:$4 sm:$0xff]  }
  0x95   : > { %v3366_v35 = vld [vmem:[#allocation2] sm:$0xee] }
  0x96   : > { %v2476_v28 = vcombine.high %v3366_v35, %v3331_v54 }
  0x97   : > { %1424 = vmatpush1.bf16.msra.mxu0 %v2822_v36  ;;  %1506 = vmatpush1.bf16.msra.mxu1 %v2825_v37  ;;  %v2906_v36 = vld [vmem:[#allocation3 + $0x480] ss:$16 sps:$4 sm:$0xff]   ;;  %v2909_v37 = vld [vmem:[#allocation3 + $0x488] ss:$16 sps:$4 sm:$0xff]  }
  0x98   : > { %1425 = vmatprep.subr.bf16.mxu0 %v2830_v38  ;;  %1507 = vmatprep.subr.bf16.mxu1 %v2833_v39  ;;  %v2915_v38 = vld [vmem:[#allocation3 + $0x4a4] ss:$16 sps:$4 sm:$0xff]   ;;  %v2918_v39 = vld [vmem:[#allocation3 + $0x4ac] ss:$16 sps:$4 sm:$0xff]  }
  0x9b   : > { %1426 = vmatpush1.bf16.msra.mxu0 %v2828_v40  ;;  %1508 = vmatpush1.bf16.msra.mxu1 %v2831_v41  ;;  %v1663_v40 = vrot.slane %v2476_v28, 1  ;;  %v2913_v41 = vld [vmem:[#allocation3 + $0x4a0] ss:$16 sps:$4 sm:$0xff]   ;;  %v2994_v28 = vld [vmem:[#allocation3 + $0x648] ss:$16 sps:$4 sm:$0xff]  }
  0x9c   : > { %1427 = vmatprep.subr.bf16.mxu0 %v2836_v42  ;;  %1509 = vmatprep.subr.bf16.mxu1 %v2839_v43  ;;  %v2916_v42 = vld [vmem:[#allocation3 + $0x4a8] ss:$16 sps:$4 sm:$0xff]   ;;  %v2921_v43 = vld [vmem:[#allocation3 + $0x4c4] ss:$16 sps:$4 sm:$0xff]  }
  0x9f   : > { %1428 = vmatpush1.bf16.msra.mxu0 %v2834_v44  ;;  %1510 = vmatpush1.bf16.msra.mxu1 %v2837_v45  ;;  %v2924_v44 = vld [vmem:[#allocation3 + $0x4cc] ss:$16 sps:$4 sm:$0xff]   ;;  %v2922_v45 = vld [vmem:[#allocation3 + $0x4c8] ss:$16 sps:$4 sm:$0xff]  }
  0xa0   : > { %1429 = vmatprep.subr.bf16.mxu0 %v2842_v46  ;;  %1511 = vmatprep.subr.bf16.mxu1 %v2845_v47  ;;  %v2927_v46 = vld [vmem:[#allocation3 + $0x4e4] ss:$16 sps:$4 sm:$0xff]   ;;  %v2930_v47 = vld [vmem:[#allocation3 + $0x4ec] ss:$16 sps:$4 sm:$0xff]  }
  0xa3   : > { %1430 = vmatpush1.bf16.msra.mxu0 %v2840_v48  ;;  %1512 = vmatpush1.bf16.msra.mxu1 %v2843_v49  ;;  %v2925_v48 = vld [vmem:[#allocation3 + $0x4e0] ss:$16 sps:$4 sm:$0xff]   ;;  %v2928_v49 = vld [vmem:[#allocation3 + $0x4e8] ss:$16 sps:$4 sm:$0xff]  }
  0xa4   : > { %1431 = vmatprep.subr.bf16.mxu0 %v2848_v50  ;;  %1513 = vmatprep.subr.bf16.mxu1 %v2851_v51  ;;  %v2933_v50 = vld [vmem:[#allocation3 + $0x504] ss:$16 sps:$4 sm:$0xff]   ;;  %v2936_v51 = vld [vmem:[#allocation3 + $0x50c] ss:$16 sps:$4 sm:$0xff]  }
  0xa7   : > { %1432 = vmatpush1.bf16.msra.mxu0 %v2846_v52  ;;  %1514 = vmatpush1.bf16.msra.mxu1 %v2849_v53  ;;  %v2931_v52 = vld [vmem:[#allocation3 + $0x500] ss:$16 sps:$4 sm:$0xff]   ;;  %v2934_v53 = vld [vmem:[#allocation3 + $0x508] ss:$16 sps:$4 sm:$0xff]  }
  0xa8   : > { %1433 = vmatprep.subr.bf16.mxu0 %v2854_v55  ;;  %1515 = vmatprep.subr.bf16.mxu1 %v2857_v56  ;;  %v2939_v55 = vld [vmem:[#allocation3 + $0x524] ss:$16 sps:$4 sm:$0xff]   ;;  %v2942_v56 = vld [vmem:[#allocation3 + $0x52c] ss:$16 sps:$4 sm:$0xff]  }
  0xab   : > { %1434 = vmatpush1.bf16.msra.mxu0 %v2852_v59  ;;  %1516 = vmatpush1.bf16.msra.mxu1 %v2855_v60  ;;  %v2937_v59 = vld [vmem:[#allocation3 + $0x520] ss:$16 sps:$4 sm:$0xff]   ;;  %v2940_v60 = vld [vmem:[#allocation3 + $0x528] ss:$16 sps:$4 sm:$0xff]  }
  0xac   : > { %1435 = vmatprep.subr.bf16.mxu0 %v2860_v61  ;;  %1517 = vmatprep.subr.bf16.mxu1 %v2863_v62  ;;  %v2945_v61 = vld [vmem:[#allocation3 + $0x544] ss:$16 sps:$4 sm:$0xff]   ;;  %v2948_v62 = vld [vmem:[#allocation3 + $0x54c] ss:$16 sps:$4 sm:$0xff]  }
  0xaf   : > { %1436 = vmatpush1.bf16.msra.mxu0 %v2858_v63  ;;  %1518 = vmatpush1.bf16.msra.mxu1 %v2861_v0  ;;  %v2943_v63 = vld [vmem:[#allocation3 + $0x540] ss:$16 sps:$4 sm:$0xff]   ;;  %v2946_v0 = vld [vmem:[#allocation3 + $0x548] ss:$16 sps:$4 sm:$0xff]  }
  0xb0   : > { %1437 = vmatprep.subr.bf16.mxu0 %v2866_v1  ;;  %1519 = vmatprep.subr.bf16.mxu1 %v2869_v2  ;;  %v2951_v1 = vld [vmem:[#allocation3 + $0x564] ss:$16 sps:$4 sm:$0xff]   ;;  %v2954_v2 = vld [vmem:[#allocation3 + $0x56c] ss:$16 sps:$4 sm:$0xff]  }
  0xb3   : > { %1438 = vmatpush1.bf16.msra.mxu0 %v2864_v3  ;;  %1520 = vmatpush1.bf16.msra.mxu1 %v2867_v4  ;;  %v2949_v3 = vld [vmem:[#allocation3 + $0x560] ss:$16 sps:$4 sm:$0xff]   ;;  %v2952_v4 = vld [vmem:[#allocation3 + $0x568] ss:$16 sps:$4 sm:$0xff]  }
  0xb4   : > { %1439 = vmatprep.subr.bf16.mxu0 %v2872_v5  ;;  %1521 = vmatprep.subr.bf16.mxu1 %v2875_v6  ;;  %v2957_v5 = vld [vmem:[#allocation3 + $0x584] ss:$16 sps:$4 sm:$0xff]   ;;  %v2960_v6 = vld [vmem:[#allocation3 + $0x58c] ss:$16 sps:$4 sm:$0xff]  }
  0xb7   : > { %1440 = vmatpush1.bf16.msra.mxu0 %v2870_v7  ;;  %1522 = vmatpush1.bf16.msra.mxu1 %v2873_v8  ;;  %v2955_v7 = vld [vmem:[#allocation3 + $0x580] ss:$16 sps:$4 sm:$0xff]   ;;  %v2958_v8 = vld [vmem:[#allocation3 + $0x588] ss:$16 sps:$4 sm:$0xff]  }
  0xb8   : > { %1441 = vmatprep.subr.bf16.mxu0 %v2878_v9  ;;  %1523 = vmatprep.subr.bf16.mxu1 %v2881_v10  ;;  %v2963_v9 = vld [vmem:[#allocation3 + $0x5a4] ss:$16 sps:$4 sm:$0xff]   ;;  %v2966_v10 = vld [vmem:[#allocation3 + $0x5ac] ss:$16 sps:$4 sm:$0xff]  }
  0xbb   : > { %1442 = vmatpush1.bf16.msra.mxu0 %v2876_v11  ;;  %1524 = vmatpush1.bf16.msra.mxu1 %v2879_v12  ;;  %v2961_v11 = vld [vmem:[#allocation3 + $0x5a0] ss:$16 sps:$4 sm:$0xff]   ;;  %v2964_v12 = vld [vmem:[#allocation3 + $0x5a8] ss:$16 sps:$4 sm:$0xff]  }
  0xbc   : > { %1443 = vmatprep.subr.bf16.mxu0 %v2884_v14  ;;  %1525 = vmatprep.subr.bf16.mxu1 %v2887_v15  ;;  %v2969_v14 = vld [vmem:[#allocation3 + $0x5c4] ss:$16 sps:$4 sm:$0xff]   ;;  %v2972_v15 = vld [vmem:[#allocation3 + $0x5cc] ss:$16 sps:$4 sm:$0xff]  }
  0xbf   : > { %1444 = vmatpush1.bf16.msra.mxu0 %v2882_v16  ;;  %1526 = vmatpush1.bf16.msra.mxu1 %v2885_v17  ;;  %v2967_v16 = vld [vmem:[#allocation3 + $0x5c0] ss:$16 sps:$4 sm:$0xff]   ;;  %v2970_v17 = vld [vmem:[#allocation3 + $0x5c8] ss:$16 sps:$4 sm:$0xff]  }
  0xc0   : > { %1445 = vmatprep.subr.bf16.mxu0 %v2890_v18  ;;  %1527 = vmatprep.subr.bf16.mxu1 %v2893_v19  ;;  %v2975_v18 = vld [vmem:[#allocation3 + $0x5e4] ss:$16 sps:$4 sm:$0xff]   ;;  %v2978_v19 = vld [vmem:[#allocation3 + $0x5ec] ss:$16 sps:$4 sm:$0xff]  }
  0xc3   : > { %1446 = vmatpush1.bf16.msra.mxu0 %v2888_v20  ;;  %1528 = vmatpush1.bf16.msra.mxu1 %v2891_v21  ;;  %v2973_v20 = vld [vmem:[#allocation3 + $0x5e0] ss:$16 sps:$4 sm:$0xff]   ;;  %v2976_v21 = vld [vmem:[#allocation3 + $0x5e8] ss:$16 sps:$4 sm:$0xff]  }
  0xc4   : > { %1456 = vmatprep.subr.bf16.mxu0 %v2896_v22  ;;  %1538 = vmatprep.subr.bf16.mxu1 %v2899_v23  ;;  %v2981_v22 = vld [vmem:[#allocation3 + $0x604] ss:$16 sps:$4 sm:$0xff]   ;;  %v2984_v23 = vld [vmem:[#allocation3 + $0x60c] ss:$16 sps:$4 sm:$0xff]  }
  0xc6   : > { %3026 = vmatmul.mubr.msk.bf16.vlgmr.msra.gmra.mrb[0].mxu0 %vm3348_vm9, %v3025_v26  ;;  %3029 = vmatmul.mubr.msk.bf16.vlgmr.msra.gmra.mrb[0].mxu1 %vm3348_vm9, %v3025_v26  ;;  %v2985_v26 = vld [vmem:[#allocation3 + $0x620] ss:$16 sps:$4 sm:$0xff]  }
  0xc7   : > { %1457 = vmatpush1.bf16.msra.mxu0 %v2894_v24  ;;  %1539 = vmatpush1.bf16.msra.mxu1 %v2897_v27  ;;  %v2979_v24 = vld [vmem:[#allocation3 + $0x600] ss:$16 sps:$4 sm:$0xff]   ;;  %v2982_v27 = vld [vmem:[#allocation3 + $0x608] ss:$16 sps:$4 sm:$0xff]  }
  0xc8   : > { %1458 = vmatprep.subr.bf16.mxu0 %v2902_v30  ;;  %1540 = vmatprep.subr.bf16.mxu1 %v2905_v31  ;;  %v2987_v30 = vld [vmem:[#allocation3 + $0x624] ss:$16 sps:$4 sm:$0xff]   ;;  %v2990_v31 = vld [vmem:[#allocation3 + $0x62c] ss:$16 sps:$4 sm:$0xff]  }
  0xc9   : > { %1488 = vmatprep.mubr.bf16.mxu0 %v3161_v13  ;;  %1570 = vmatprep.mubr.bf16.mxu1 %v3161_v13 }
  0xcb   : > { %1459 = vmatpush1.bf16.msra.mxu0 %v2900_v32  ;;  %1541 = vmatpush1.bf16.msra.mxu1 %v2903_v33  ;;  %v2988_v32 = vld [vmem:[#allocation3 + $0x628] ss:$16 sps:$4 sm:$0xff]   ;;  %v2993_v33 = vld [vmem:[#allocation3 + $0x644] ss:$16 sps:$4 sm:$0xff]  }
  0xcc   : > { %2030 = vmatprep.subr.bf16.mxu0 %v2908_v34  ;;  %2112 = vmatprep.subr.bf16.mxu1 %v2911_v29  ;;  %v2996_v34 = vld [vmem:[#allocation3 + $0x64c] ss:$16 sps:$4 sm:$0xff]   ;;  %v2991_v29 = vld [vmem:[#allocation3 + $0x640] ss:$16 sps:$4 sm:$0xff]  }
  0xd2   : > { %2473 = vmatmul.mubr.msk.bf16.vlgmr.msra.gmra.mrb[0].mxu0 %vm879_vm8, %v2400_v25  ;;  %2474 = vmatmul.mubr.msk.bf16.vlgmr.msra.gmra.mrb[0].mxu1 %vm879_vm8, %v2400_v25  ;;  %v2999_v25 = vld [vmem:[#allocation3 + $0x664] ss:$16 sps:$4 sm:$0xff]  }
  0xd3   : > { %2031 = vmatpush1.bf16.msra.mxu0 %v2906_v36  ;;  %2113 = vmatpush1.bf16.msra.mxu1 %v2909_v37  ;;  %v3002_v36 = vld [vmem:[#allocation3 + $0x66c] ss:$16 sps:$4 sm:$0xff]   ;;  %v2475_v37 = vcombine.low %v3366_v35, %v3331_v54  ;;  %v3009_v54 = vld [vmem:[#allocation3 + $0x6a0] ss:$16 sps:$4 sm:$0xff]   ;;  %v3012_v35 = vld [vmem:[#allocation3 + $0x6a8] ss:$16 sps:$4 sm:$0xff]  }
  0xd4   : > { %2032 = vmatprep.subr.bf16.mxu0 %v2915_v38  ;;  %2114 = vmatprep.subr.bf16.mxu1 %v2918_v39  ;;  %v2997_v38 = vld [vmem:[#allocation3 + $0x660] ss:$16 sps:$4 sm:$0xff]   ;;  %v3000_v39 = vld [vmem:[#allocation3 + $0x668] ss:$16 sps:$4 sm:$0xff]  }
  0xd5   : > { %2062 = vmatprep.mubr.bf16.mxu0 %v1663_v40  ;;  %2144 = vmatprep.mubr.bf16.mxu1 %v1663_v40  ;;  %v3005_v40 = vld [vmem:[#allocation3 + $0x684] ss:$16 sps:$4 sm:$0xff]  }
  0xd7   : > { %2033 = vmatpush1.bf16.msra.mxu0 %v2913_v41  ;;  %2115 = vmatpush1.bf16.msra.mxu1 %v2916_v42  ;;  %v3008_v41 = vld [vmem:[#allocation3 + $0x68c] ss:$16 sps:$4 sm:$0xff]   ;;  %v1662_v42 = vrot.slane %v2475_v37, 1 }
  0xd8   : > { %2034 = vmatprep.subr.bf16.mxu0 %v2921_v43  ;;  %2116 = vmatprep.subr.bf16.mxu1 %v2924_v44  ;;  %v3003_v43 = vld [vmem:[#allocation3 + $0x680] ss:$16 sps:$4 sm:$0xff]   ;;  %v3006_v44 = vld [vmem:[#allocation3 + $0x688] ss:$16 sps:$4 sm:$0xff]  }
  0xdb   : > { %2035 = vmatpush1.bf16.msra.mxu0 %v2919_v57  ;;  %2117 = vmatpush1.bf16.msra.mxu1 %v2922_v45  ;;  %v3011_v57 = vld [vmem:[#allocation3 + $0x6a4] ss:$16 sps:$4 sm:$0xff]   ;;  %v3014_v45 = vld [vmem:[#allocation3 + $0x6ac] ss:$16 sps:$4 sm:$0xff]  }
  0xdc   : > { %2036 = vmatprep.subr.bf16.mxu0 %v2927_v46  ;;  %2118 = vmatprep.subr.bf16.mxu1 %v2930_v47  ;;  %v1580_v46 = vld [vmem:[#allocation2 + $0x8] sm:$0xe] }
  0xdd   : > { %v2477_v47 = vcombine.low %v1580_v46, %v3337_v58 }
  0xdf   : > { %2037 = vmatpush1.bf16.msra.mxu0 %v2925_v48  ;;  %2119 = vmatpush1.bf16.msra.mxu1 %v2928_v49  ;;  %v1664_v48 = vrot.slane %v2477_v47, 1 }
  0xe0   : > { %2038 = vmatprep.subr.bf16.mxu0 %v2933_v50  ;;  %2120 = vmatprep.subr.bf16.mxu1 %v2936_v51 }
  0xe3   : > { %2039 = vmatpush1.bf16.msra.mxu0 %v2931_v52  ;;  %2121 = vmatpush1.bf16.msra.mxu1 %v2934_v53 }
  0xe4   : > { %2040 = vmatprep.subr.bf16.mxu0 %v2939_v55  ;;  %2122 = vmatprep.subr.bf16.mxu1 %v2942_v56 }
  0xe7   : > { %2041 = vmatpush1.bf16.msra.mxu0 %v2937_v59  ;;  %2123 = vmatpush1.bf16.msra.mxu1 %v2940_v60 }
  0xe8   : > { %2042 = vmatprep.subr.bf16.mxu0 %v2945_v61  ;;  %2124 = vmatprep.subr.bf16.mxu1 %v2948_v62 }
  0xeb   : > { %2043 = vmatpush1.bf16.msra.mxu0 %v2943_v63  ;;  %2125 = vmatpush1.bf16.msra.mxu1 %v2946_v0 }
  0xec   : > { %2044 = vmatprep.subr.bf16.mxu0 %v2951_v1  ;;  %2126 = vmatprep.subr.bf16.mxu1 %v2954_v2 }
  0xef   : > { %2045 = vmatpush1.bf16.msra.mxu0 %v2949_v3  ;;  %2127 = vmatpush1.bf16.msra.mxu1 %v2952_v4 }
  0xf0   : > { %2046 = vmatprep.subr.bf16.mxu0 %v2957_v5  ;;  %2128 = vmatprep.subr.bf16.mxu1 %v2960_v6 }
  0xf3   : > { %2047 = vmatpush1.bf16.msra.mxu0 %v2955_v7  ;;  %2129 = vmatpush1.bf16.msra.mxu1 %v2958_v8 }
  0xf4   : > { %2048 = vmatprep.subr.bf16.mxu0 %v2963_v9  ;;  %2130 = vmatprep.subr.bf16.mxu1 %v2966_v10 }
  0xf7   : > { %2049 = vmatpush1.bf16.msra.mxu0 %v2961_v11  ;;  %2131 = vmatpush1.bf16.msra.mxu1 %v2964_v12 }
  0xf8   : > { %2050 = vmatprep.subr.bf16.mxu0 %v2969_v14  ;;  %2132 = vmatprep.subr.bf16.mxu1 %v2972_v15 }
  0xfb   : > { %2051 = vmatpush1.bf16.msra.mxu0 %v2967_v16  ;;  %2133 = vmatpush1.bf16.msra.mxu1 %v2970_v17 }
  0xfc   : > { %2052 = vmatprep.subr.bf16.mxu0 %v2975_v18  ;;  %2134 = vmatprep.subr.bf16.mxu1 %v2978_v19 }
  0xff   : > { %2053 = vmatpush1.bf16.msra.mxu0 %v2973_v20  ;;  %2135 = vmatpush1.bf16.msra.mxu1 %v2976_v21 }
 0x100   : > { %2054 = vmatprep.subr.bf16.mxu0 %v2981_v22  ;;  %2136 = vmatprep.subr.bf16.mxu1 %v2984_v23 }
 0x103   : > { %2055 = vmatpush1.bf16.msra.mxu0 %v2979_v24  ;;  %2137 = vmatpush1.bf16.msra.mxu1 %v2982_v27 }
 0x104   : > { %2056 = vmatprep.subr.bf16.mxu0 %v2987_v30  ;;  %2138 = vmatprep.subr.bf16.mxu1 %v2990_v31 }
 0x107   : > { %2057 = vmatpush1.bf16.msra.mxu0 %v2985_v26  ;;  %2139 = vmatpush1.bf16.msra.mxu1 %v2988_v32 }
 0x108   : > { %2058 = vmatprep.subr.bf16.mxu0 %v2993_v33  ;;  %2140 = vmatprep.subr.bf16.mxu1 %v2996_v34 }
 0x10b   : > { %2059 = vmatpush1.bf16.msra.mxu0 %v2991_v29  ;;  %2141 = vmatpush1.bf16.msra.mxu1 %v2994_v28 }
 0x10c   : > { %2060 = vmatprep.subr.bf16.mxu0 %v2999_v25  ;;  %2142 = vmatprep.subr.bf16.mxu1 %v3002_v36 }
 0x10f   : > { %2061 = vmatpush1.bf16.msra.mxu0 %v2997_v38  ;;  %2143 = vmatpush1.bf16.msra.mxu1 %v3000_v39 }
 0x110   : > { %2071 = vmatprep.subr.bf16.mxu0 %v3005_v40  ;;  %2153 = vmatprep.subr.bf16.mxu1 %v3008_v41 }
 0x112   : > { %2063 = vmatmul.mubr.bf16.vlgmr.msra.gmra.mrb[0].mxu0 %v1662_v42  ;;  %2145 = vmatmul.mubr.bf16.vlgmr.msra.gmra.mrb[0].mxu1 %v1662_v42 }
 0x113   : > { %2072 = vmatpush1.bf16.msra.mxu0 %v3003_v43  ;;  %2154 = vmatpush1.bf16.msra.mxu1 %v3006_v44 }
 0x114   : > { %2073 = vmatprep.subr.bf16.mxu0 %v3011_v57  ;;  %2155 = vmatprep.subr.bf16.mxu1 %v3014_v45 }
 0x115   : > { %2103 = vmatprep.mubr.bf16.mxu0 %v3161_v13  ;;  %2185 = vmatprep.mubr.bf16.mxu1 %v3161_v13 }
 0x117   : > { %2074 = vmatpush1.bf16.msra.mxu0 %v3009_v54  ;;  %2156 = vmatpush1.bf16.msra.mxu1 %v3012_v35 }
 0x11e   : > { %2550 = vmatmul.mubr.msk.bf16.vlgmr.msra.gmra.mrb[0].mxu0 %vm879_vm8, %v1664_v48  ;;  %2551 = vmatmul.mubr.msk.bf16.vlgmr.msra.gmra.mrb[0].mxu1 %vm879_vm8, %v1664_v48 }
 0x1f1   : > { %v2105_v49 = vpop.f32.mrb[0].mxu0  ;;  %v2187_v58 = vpop.f32.mrb[0].mxu1 }
 0x1f2   : > { %2198 = vst [vmem:[%s219_s28] sm:$0xff] %v2105_v49  ;;  %2200 = vst [vmem:[%s219_s28 + $0x10] sm:$0xff] %v2187_v58  ;;  %v2107_v13 = vpop.f32.mrb[1].mxu0  ;;  %v2189_v50 = vpop.f32.mrb[1].mxu1 }
 0x1f3   : > { %2199 = vst [vmem:[%s219_s28 + $0x8] sm:$0xff] %v2107_v13  ;;  %2201 = vst [vmem:[%s219_s28 + $0x18] sm:$0xff] %v2189_v50  ;;  %v2109_v51 = vpop.f32.mrb[2].mxu0  ;;  %v2191_v52 = vpop.f32.mrb[2].mxu1 }
 0x1f4   : > { %v2110_v53 = vpop.f32.mrb[3].mxu0  ;;  %v2192_v55 = vpop.f32.mrb[3].mxu1 }
 0x1f5   : > { %3071 = shalt.err (!%p3068_p7)
}
 0x1f6   : > { %s3072_s7 = scalar_lea.hbm %s3389_s13, 512  ;;  %s3076_s23 = scalar_lea.hbm %s3444_s4, 2048 }
 0x1f7   : > { %p3073_p9 = scmp.ne.s32.totalorder %s3389_s13, %s3072_s7  ;;  %p3077_p1 = scmp.lt.u32.totalorder %s3389_s13, %s3444_s4 }
 0x1f8   : > { %p3078_p4 = scmp.lt.u32.totalorder %s3076_s23, %s3072_s7  ;;  %p3080_p8 = scmp.lt.u32.totalorder %s3072_s7, %s3389_s13 }
 0x1f9   : > { %p3074_p11 = pnand %p3073_p9, %p3460_p10 }
 0x1fa   : > { %p3079_p3 = por %p3078_p4, %p3077_p1 }
 0x1fb   : > { %p3075_p13 = pneg %p3074_p11 }
 0x1fc   : > { %p3081_p12 = por %p3080_p8, %p3079_p3 }
 0x1fe   : > { %p3082_p0 = pnand %p3081_p12, %p3075_p13 }
 0x200   : > { %3085 = shalt.err (!%p3082_p0)
}
 0x201   : > { %2608 = dma.vmem_to_hbm [thread:$0]  (%p3460_p10), %s3384_s27, 512, %s3389_s13, %s2203_s18  }
 0x202 PF: > { %p2620_p2 = scmp.ge.s32.totalorder %s3156_s22, 2  ;;  %s2231_s6 = sand.u32 1, %s3128_s15  }
 0x203   : > { %p3461_p5 = scmp.ne.s32.totalorder %s3450_s30, 0  ;;  %s2232_s10 = scalar_lea.sflag [#allocation5], %s2231_s6 }
 0x205   : > { %p2615_p6 = pnand %p2620_p2, %p3461_p5 }
 0x207   : > { %3123 = dma.done.wait (!%p2615_p6), %s2232_s10, 512  }
 0x208   : > { %3125 = vsyncadd (!%p2615_p6), %s2232_s10, 4294966784  ;;  %s18_s22 = sadd.s32 1, %s3156_s22   ;;  %s3462_s15 = smov %s3132_s16 }
 0x209   : > { %p15_p7 = scmp.ge.s32.totalorder %s18_s22, 6   ;;  %s3463_s16 = smov %s3136_s17 }
 0x20a   : > { %s3464_s17 = smov %s3267_s9  ;;  %s3465_s18 = smov %s3148_s20 }
 0x20b   : > { %s3466_s19 = smov %s3152_s21  ;;  %s3467_s20 = smov %s3470_s25 }
 0x20c   : > { %s3468_s21 = smov %s3474_s26  ;;  %17 = sbr.rel (!%p15_p7) target bundleno = 6 (0x6), region = 79 }
 0x213   :  { %2237 = vsyncpa [#allocation4], 1 }
 0x214   :  { %2239 = vsyncpa [#allocation4 + $0x1], 1 }
 0x215   :  { %2240 = vsyncpa [#allocation5], 1 }
 0x216   :  { %2242 = vsyncpa [#allocation5 + $0x1], 1 }

</bundles_post_ra>
